<compile_context>
chip_gen: v7x
topology: tpu7x:2x2x1
jax: 0.10.0
libtpu: 0.0.40
codegen_flags: <defaults>
</compile_context>

<pallas_src>
import functools

import numpy as np

import jax
import jax.numpy as jnp
from jax.experimental import pallas as pl
from jax.experimental.pallas import tpu as pltpu


# ----------------------------------------------------------------------------- helpers --
def _softplus(x):
    # Numerically stable softplus; matches torch.nn.Softplus (beta=1) within fp32 tol.
    return jnp.maximum(x, 0.0) + jnp.log(1.0 + jnp.exp(-jnp.abs(x)))


def _sigmoid(x):
    return 1.0 / (1.0 + jnp.exp(-x))


def _interp_matrix(out_n, in_n):
    """(out_n, in_n) bilinear align_corners interpolation weights (host-built constant)."""
    m = np.zeros((out_n, in_n), np.float32)
    if out_n == 1 or in_n == 1:
        m[:, 0] = 1.0
        return jnp.asarray(m)
    scale = (in_n - 1) / (out_n - 1)
    for o in range(out_n):
        src = o * scale
        lo = min(int(np.floor(src)), in_n - 1)
        hi = min(lo + 1, in_n - 1)
        f = src - lo
        m[o, lo] += 1.0 - f
        m[o, hi] += f
    return jnp.asarray(m)


def _resize_bilinear_matmul(x, out_hw):
    """NCHW bilinear resize, align_corners=True, as two MXU matmuls (plain JAX)."""
    B, C, H, W = x.shape
    oh, ow = out_hw
    if (H, W) == (oh, ow):
        return x
    wy = _interp_matrix(oh, H)                      # (oh, H)
    wx = _interp_matrix(ow, W)                      # (ow, W)
    hp = jax.lax.Precision.HIGHEST
    y = jnp.einsum("oh,bchw->bcow", wy, x.astype(jnp.float32), precision=hp)
    z = jnp.einsum("pw,bcow->bcop", wx, y, precision=hp)
    return z.astype(x.dtype)


def _resize_bilinear_gather(x, out_hw):
    """Gather-based align_corners bilinear resize (reference-only, validates matmul form)."""
    B, C, H, W = x.shape
    oh, ow = out_hw
    if (H, W) == (oh, ow):
        return x

    def coords(out_n, in_n):
        if out_n == 1:
            return jnp.zeros((1,), jnp.float32)
        return jnp.arange(out_n, dtype=jnp.float32) * ((in_n - 1) / (out_n - 1))

    ys, xs = coords(oh, H), coords(ow, W)
    y0 = jnp.clip(jnp.floor(ys).astype(jnp.int32), 0, H - 1)
    y1 = jnp.clip(y0 + 1, 0, H - 1)
    x0 = jnp.clip(jnp.floor(xs).astype(jnp.int32), 0, W - 1)
    x1 = jnp.clip(x0 + 1, 0, W - 1)
    wy = (ys - y0.astype(jnp.float32))[None, None, :, None]
    wx = (xs - x0.astype(jnp.float32))[None, None, None, :]
    g = lambda yi, xi: x[:, :, yi, :][:, :, :, xi]
    top = g(y0, x0) * (1.0 - wx) + g(y0, x1) * wx
    bot = g(y1, x0) * (1.0 - wx) + g(y1, x1) * wx
    return top * (1.0 - wy) + bot * wy


def _pick_hw_tile(hw, target=4096):
    """Largest multiple-of-128 divisor of hw that is <= target (lane-dense tiles)."""
    if hw % 128 != 0:
        # TODO(synk): pad the spatial axis to a multiple of 128 instead of one full block.
        return hw
    t = min(target, hw)
    t -= t % 128
    while hw % t != 0:
        t -= 128
    return t


def _ipow(v, n):
    out = v
    for _ in range(int(n) - 1):
        out = out * v
    return out


# ----------------------------------------------------------------------------- kernels --
def _gate_kernel(*refs, c_in, hidden, inv_hw, has_emb):
    """Pass 1: conv1 + ReLU per HW tile, accumulate global mean, SE excite -> gate."""
    if has_emb:
        x_ref, emb_ref, pk1_ref, gate_ref, acc_ref = refs
    else:
        x_ref, pk1_ref, gate_ref, acc_ref = refs
        emb_ref = None
    t = pl.program_id(1)

    @pl.when(t == 0)
    def _():
        acc_ref[...] = jnp.zeros_like(acc_ref)

    xf = x_ref[0].astype(jnp.float32)                               # (C_in, tile)
    if has_emb:
        xf = xf + emb_ref[0].astype(jnp.float32)                    # fused embedding add

    w1 = pk1_ref[:, 0:c_in]                                         # (mlp, C_in)
    b1 = pk1_ref[:, c_in:c_in + 1]                                  # (mlp, 1)
    h = jnp.maximum(jnp.dot(w1, xf, preferred_element_type=jnp.float32) + b1, 0.0)
    acc_ref[...] += jnp.sum(h, axis=1, keepdims=True)               # lane-sum -> (mlp, 1)

    @pl.when(t == pl.num_programs(1) - 1)
    def _():
        y = acc_ref[...] * inv_hw                                   # global mean (mlp, 1)
        sw1 = pk1_ref[:, c_in + 1:c_in + 1 + hidden]                # fc1.weight.T (mlp, hid)
        sw2 = pk1_ref[:, c_in + 1 + hidden:c_in + 1 + 2 * hidden]   # fc2.weight   (mlp, hid)
        t1 = jnp.maximum(jnp.sum(y * sw1, axis=0, keepdims=True), 0.0)   # (1, hidden)
        gate = _sigmoid(jnp.sum(sw2 * t1, axis=1, keepdims=True))        # (mlp, 1)
        gate_ref[0] = gate.astype(gate_ref.dtype)


def _attractor_kernel(*refs, c_in, mlp_dim, n_attractors, alpha, gamma, kind,
                      attractor_type, has_emb):
    """Pass 2: conv1+ReLU, *gate, conv2+Softplus -> A, attractor update of bin centers."""
    if has_emb:
        x_ref, emb_ref, b_ref, gate_ref, pk1_ref, pk2_ref, o_ref = refs
    else:
        x_ref, b_ref, gate_ref, pk1_ref, pk2_ref, o_ref = refs
        emb_ref = None

    xf = x_ref[0].astype(jnp.float32)                               # (C_in, tile)
    if has_emb:
        xf = xf + emb_ref[0].astype(jnp.float32)

    w1 = pk1_ref[:, 0:c_in]
    b1 = pk1_ref[:, c_in:c_in + 1]
    h = jnp.maximum(jnp.dot(w1, xf, preferred_element_type=jnp.float32) + b1, 0.0)
    h = h * gate_ref[0]                                             # (mlp,1) bcast over HW

    w2 = pk2_ref[:, 0:mlp_dim]                                      # (nA, mlp)
    b2 = pk2_ref[:, mlp_dim:mlp_dim + 1]                            # (nA, 1)
    a = _softplus(jnp.dot(w2, h, preferred_element_type=jnp.float32) + b2)  # (nA, tile)

    bprev = b_ref[0].astype(jnp.float32)                            # (n_bins, tile)

    delta = None
    for i in range(n_attractors):                                   # static unroll, 2-D tiles
        dx = a[i:i + 1, :] - bprev                                  # sublane bcast
        if attractor_type == "exp":
            # |dx|**gamma == dx**gamma for even integer gamma -> drop abs (VALU trim)
            mag = _ipow(dx if gamma % 2 == 0 else jnp.abs(dx), gamma)
            dc = jnp.exp(-alpha * mag) * dx
        else:  # 'inv'
            dc = dx * pl.reciprocal(1.0 + alpha * _ipow(dx, gamma), approx=True)
        delta = dc if delta is None else delta + dc
    if kind == "mean":
        delta = delta * (1.0 / n_attractors)

    o_ref[0] = (bprev + delta).astype(o_ref.dtype)


# ----------------------------------------------------------------------------- wrapper --
def xcs_attractor_layer_unnormed(x, b_prev, params, *, prev_b_embedding=None,
                                 interpolate=True, alpha=300.0, gamma=2,
                                 kind="sum", attractor_type="exp", hw_tile=None):
    """x: (B, C_in, H, W);  b_prev: (B, n_bins, Hp, Wp);  params: weight dict.

    Returns (b_new_centers, B_centers) like the PyTorch module (they are identical).
    """
    if int(gamma) != gamma:
        raise NotImplementedError("gamma must be an integer (matches torch.jit.script sig)")
    gamma = int(gamma)

    B, C_in, H, W = x.shape
    HW = H * W

    w1c, b1c = params["conv1_w"], params["conv1_b"]      # (mlp, C_in), (mlp,)
    sew1, sew2 = params["se_w1"], params["se_w2"]        # (mlp, hidden) = fc1.w.T / fc2.w
    w2c, b2c = params["conv2_w"], params["conv2_b"]      # (nA, mlp), (nA,)
    mlp_dim = w1c.shape[0]
    hidden = sew1.shape[1]
    n_attractors = w2c.shape[0]
    n_bins = b_prev.shape[1]

    has_emb = prev_b_embedding is not None
    if has_emb and interpolate:
        prev_b_embedding = _resize_bilinear_matmul(prev_b_embedding, (H, W))
    b_prev_r = _resize_bilinear_matmul(b_prev, (H, W))

    f32 = jnp.float32
    # Packed weight slabs: fewer tiny DMAs / padded VMEM buffers; sliced statically in-kernel.
    pk1 = jnp.concatenate([w1c, b1c[:, None], sew1, sew2], axis=1).astype(f32)  # (mlp, C+1+2h)
    pk2 = jnp.concatenate([w2c, b2c[:, None]], axis=1).astype(f32)              # (nA, mlp+1)
    kp1 = C_in + 1 + 2 * hidden
    kp2 = mlp_dim + 1

    tile = hw_tile if hw_tile is not None else _pick_hw_tile(HW)
    assert HW % tile == 0, (HW, tile)
    T = HW // tile

    x2 = x.reshape(B, C_in, HW)
    b2 = b_prev_r.reshape(B, n_bins, HW)
    emb2 = prev_b_embedding.reshape(B, C_in, HW) if has_emb else None

    const2 = lambda b, t: (0, 0)
    x_spec = pl.BlockSpec((1, C_in, tile), lambda b, t: (b, 0, t))
    b_spec = pl.BlockSpec((1, n_bins, tile), lambda b, t: (b, 0, t))
    gate_spec = pl.BlockSpec((1, mlp_dim, 1), lambda b, t: (b, 0, 0))
    pk1_spec = pl.BlockSpec((mlp_dim, kp1), const2)
    pk2_spec = pl.BlockSpec((n_attractors, kp2), const2)

    # ---- pass 1: per-batch SE gate (global-HW mean forces the 2-pass split) ----
    gate_kernel = functools.partial(_gate_kernel, c_in=C_in, hidden=hidden,
                                    inv_hw=1.0 / HW, has_emb=has_emb)
    gate_specs = [x_spec] + ([x_spec] if has_emb else []) + [pk1_spec]
    gate_args = [x2] + ([emb2] if has_emb else []) + [pk1]
    gate = pl.pallas_call(
        gate_kernel,
        out_shape=jax.ShapeDtypeStruct((B, mlp_dim, 1), f32),
        grid_spec=pltpu.PrefetchScalarGridSpec(
            num_scalar_prefetch=0,
            grid=(B, T),
            in_specs=gate_specs,
            out_specs=gate_spec,
            scratch_shapes=[pltpu.VMEM((mlp_dim, 1), f32)],
        ),
        compiler_params=pltpu.CompilerParams(
            dimension_semantics=("parallel", "arbitrary")),
    )(*gate_args)

    # ---- pass 2: gated conv2 + softplus + attractor update, tiled over HW ----
    main_kernel = functools.partial(
        _attractor_kernel, c_in=C_in, mlp_dim=mlp_dim, n_attractors=int(n_attractors),
        alpha=float(alpha), gamma=gamma, kind=kind, attractor_type=attractor_type,
        has_emb=has_emb)
    main_specs = ([x_spec] + ([x_spec] if has_emb else [])
                  + [b_spec, gate_spec, pk1_spec, pk2_spec])
    main_args = [x2] + ([emb2] if has_emb else []) + [b2, gate, pk1, pk2]
    out = pl.pallas_call(
        main_kernel,
        out_shape=jax.ShapeDtypeStruct((B, n_bins, HW), b_prev.dtype),
        grid_spec=pltpu.PrefetchScalarGridSpec(
            num_scalar_prefetch=0,
            grid=(B, T),
            in_specs=main_specs,
            out_specs=pl.BlockSpec((1, n_bins, tile), lambda b, t: (b, 0, t)),
        ),
        compiler_params=pltpu.CompilerParams(
            dimension_semantics=("parallel", "parallel")),
    )(*main_args)

    b_new = out.reshape(B, n_bins, H, W)
    return b_new, b_new


# --------------------------------------------------------------------------- reference --
def xcs_attractor_ref(x, b_prev, params, *, prev_b_embedding=None, interpolate=True,
                      alpha=300.0, gamma=2, kind="sum", attractor_type="exp"):
    """Pure-JAX reference mirroring the PyTorch forward (uses gather-based resize)."""
    if prev_b_embedding is not None:
        if interpolate:
            prev_b_embedding = _resize_bilinear_gather(prev_b_embedding, x.shape[-2:])
        x = x + prev_b_embedding

    w1c, b1c = params["conv1_w"], params["conv1_b"]
    sew1, sew2 = params["se_w1"], params["se_w2"]
    w2c, b2c = params["conv2_w"], params["conv2_b"]
    hp = jax.lax.Precision.HIGHEST

    xf = x.astype(jnp.float32)
    h = jnp.einsum("oc,bchw->bohw", w1c, xf, precision=hp) + b1c[None, :, None, None]
    h = jnp.maximum(h, 0.0)
    y = jnp.mean(h, axis=(2, 3))                                        # (B, mlp)
    t = jnp.maximum(jnp.einsum("bc,ck->bk", y, sew1, precision=hp), 0.0)
    g = _sigmoid(jnp.einsum("bk,ck->bc", t, sew2, precision=hp))
    h = h * g[:, :, None, None]
    a = jnp.einsum("ac,bchw->bahw", w2c, h, precision=hp) + b2c[None, :, None, None]
    a = _softplus(a)

    bp = _resize_bilinear_gather(b_prev, x.shape[-2:]).astype(jnp.float32)
    dx = a[:, :, None] - bp[:, None]                                    # (B,nA,nbins,H,W)
    if attractor_type == "exp":
        dc = jnp.exp(-alpha * jnp.abs(dx) ** gamma) * dx
    else:
        dc = dx / (1.0 + alpha * dx ** gamma)
    delta = dc.sum(axis=1) if kind == "sum" else dc.mean(axis=1)
    b_new = bp + delta
    return b_new, b_new


# --------------------------------------------------------------------------------- main --
if __name__ == "__main__":
    # XcsAttractorLayerUnnormed(in_features=32, n_bins=16, n_attractors=16, mlp_dim=128)
    B, C_in, H, W = 2, 32, 16, 16              # HW = 256 -> lane-dense last dim
    Hp, Wp = 8, 8                              # b_prev / embedding at half resolution
    mlp_dim, reduction = 128, 16               # SELayer(mlp_dim) -> hidden = 8
    n_attractors, n_bins = 16, 16
    hidden = mlp_dim // reduction
    alpha, gamma = 2.0, 2                      # small alpha so the attractor term is non-trivial

    key = jax.random.PRNGKey(0)
    kx, kb, ke, k1, k2, k3, k4, k5, k6 = jax.random.split(key, 9)

    x = jax.random.normal(kx, (B, C_in, H, W), dtype=jnp.float32)
    b_prev = jax.random.normal(kb, (B, n_bins, Hp, Wp), dtype=jnp.float32) * 0.5 + 1.0
    emb = jax.random.normal(ke, (B, C_in, Hp, Wp), dtype=jnp.float32) * 0.3

    params = {
        # 1x1 conv weights stored squeezed as (C_out, C_in); SE matrices stored so both are
        # (mlp_dim, hidden): se_w1 = fc1.weight.T, se_w2 = fc2.weight.
        "conv1_w": jax.random.normal(k1, (mlp_dim, C_in), jnp.float32) * 0.1,
        "conv1_b": jax.random.normal(k2, (mlp_dim,), jnp.float32) * 0.1,
        "se_w1": jax.random.normal(k3, (mlp_dim, hidden), jnp.float32) * 0.1,
        "se_w2": jax.random.normal(k4, (mlp_dim, hidden), jnp.float32) * 0.1,
        "conv2_w": jax.random.normal(k5, (n_attractors, mlp_dim), jnp.float32) * 0.05,
        "conv2_b": jax.random.normal(k6, (n_attractors,), jnp.float32) * 0.1,
    }

    # Path 1: fused prev_b_embedding add + resized b_prev, forced 2 HW tiles per batch.
    b_new, B_centers = xcs_attractor_layer_unnormed(
        x, b_prev, params, prev_b_embedding=emb, alpha=alpha, gamma=gamma,
        kind="sum", attractor_type="exp", hw_tile=128)
    jax.block_until_ready(b_new)
    ref, _ = xcs_attractor_ref(x, b_prev, params, prev_b_embedding=emb, alpha=alpha,
                               gamma=gamma, kind="sum", attractor_type="exp")
    assert b_new.shape == (B, n_bins, H, W)
    err1 = float(jnp.max(jnp.abs(b_new - ref)))
    assert jnp.allclose(b_new, ref, atol=2e-3, rtol=2e-3), f"mismatch (emb path): {err1}"

    # Path 2: no embedding, auto tile selection (single HW tile).
    b_new2, _ = xcs_attractor_layer_unnormed(
        x, b_prev, params, alpha=alpha, gamma=gamma, kind="sum", attractor_type="exp")
    jax.block_until_ready(b_new2)
    ref2, _ = xcs_attractor_ref(x, b_prev, params, alpha=alpha, gamma=gamma,
                                kind="sum", attractor_type="exp")
    assert b_new2.shape == (B, n_bins, H, W)
    err2 = float(jnp.max(jnp.abs(b_new2 - ref2)))
    assert jnp.allclose(b_new2, ref2, atol=2e-3, rtol=2e-3), f"mismatch (no-emb path): {err2}"

    print("KERNEL_OK")
</pallas_src>

<mosaic_0001>
module attributes {stable_mosaic.version = 11 : i64} {
  func.func @_gate_kernel(%arg0: i32, %arg1: i32, %arg2: memref<1x32x128xf32, #tpu.memory_space<vmem>>, %arg3: memref<1x32x128xf32, #tpu.memory_space<vmem>>, %arg4: memref<128x49xf32, #tpu.memory_space<vmem>>, %arg5: memref<1x128x1xf32, #tpu.memory_space<vmem>>, %arg6: memref<128x1xf32, #tpu.memory_space<vmem>>) attributes {dimension_semantics = [#tpu.dimension_semantics<parallel>, #tpu.dimension_semantics<arbitrary>], iteration_bounds = array<i64: 2, 2>, scalar_prefetch = 0 : i64, scratch_operands = 1 : i64, tpu.core_type = #tpu.core_type<tc>, window_params = [{transform_indices = @transform_0, window_bounds = array<i64: 1, 32, 128>}, {transform_indices = @transform_1, window_bounds = array<i64: 1, 32, 128>}, {pipeline_mode = #tpu.pipeline_mode<synchronous>, transform_indices = @transform_2, window_bounds = array<i64: 128, 49>}, {transform_indices = @transform_3, window_bounds = array<i64: 1, 128, 1>}]} {
    %c0_i32 = arith.constant 0 : i32
    %0 = arith.cmpi eq, %arg1, %c0_i32 : i32
    %1 = arith.extui %0 : i1 to i32
    %c0_i32_0 = arith.constant 0 : i32
    %2 = arith.cmpi ne, %1, %c0_i32_0 : i32
    scf.if %2 {
      %cst_16 = arith.constant 0.000000e+00 : f32
      %23 = vector.broadcast %cst_16 : f32 to vector<128x1xf32>
      %c0_17 = arith.constant 0 : index
      %c0_18 = arith.constant 0 : index
      %24 = vector.load %arg6[%c0_17, %c0_18] : memref<128x1xf32, #tpu.memory_space<vmem>>, vector<128x1xf32>
      tpu.vector_store %arg6[%c0_17, %c0_18], %23 {strides = array<i32>} : memref<128x1xf32, #tpu.memory_space<vmem>>, vector<128x1xf32>,
    } else {
    }
    %c0 = arith.constant 0 : index
    %c0_1 = arith.constant 0 : index
    %c0_2 = arith.constant 0 : index
    %3 = vector.load %arg2[%c0, %c0_1, %c0_2] : memref<1x32x128xf32, #tpu.memory_space<vmem>>, vector<1x32x128xf32>
    %4 = vector.shape_cast %3 : vector<1x32x128xf32> to vector<32x128xf32>
    %c0_3 = arith.constant 0 : index
    %c0_4 = arith.constant 0 : index
    %c0_5 = arith.constant 0 : index
    %5 = vector.load %arg3[%c0_3, %c0_4, %c0_5] : memref<1x32x128xf32, #tpu.memory_space<vmem>>, vector<1x32x128xf32>
    %6 = vector.shape_cast %5 : vector<1x32x128xf32> to vector<32x128xf32>
    %7 = arith.addf %4, %6 : vector<32x128xf32>
    %c0_6 = arith.constant 0 : index
    %c0_7 = arith.constant 0 : index
    %8 = vector.load %arg4[%c0_6, %c0_7] : memref<128x49xf32, #tpu.memory_space<vmem>>, vector<128x32xf32>
    %c0_8 = arith.constant 0 : index
    %c32 = arith.constant 32 : index
    %9 = vector.load %arg4[%c0_8, %c32] : memref<128x49xf32, #tpu.memory_space<vmem>>, vector<128x1xf32>
    %cst = arith.constant dense<0.000000e+00> : vector<128x128xf32>
    %10 = tpu.matmul %8, %7, %cst {dimension_numbers = #tpu.dot_dimension_numbers<[1], [0], [0], [1], [0, 0, 1, 1], [], []>} : vector<128x32xf32>, vector<32x128xf32>, vector<128x128xf32> -> vector<128x128xf32>
    %11 = vector.broadcast %9 : vector<128x1xf32> to vector<128x128xf32>
    %12 = arith.addf %10, %11 : vector<128x128xf32>
    %cst_9 = arith.constant 0.000000e+00 : f32
    %13 = vector.broadcast %cst_9 : f32 to vector<128x128xf32>
    %14 = arith.maximumf %12, %13 : vector<128x128xf32>
    %c0_10 = arith.constant 0 : index
    %c0_11 = arith.constant 0 : index
    %15 = vector.load %arg6[%c0_10, %c0_11] : memref<128x1xf32, #tpu.memory_space<vmem>>, vector<128x1xf32>
    %cst_12 = arith.constant dense<0.000000e+00> : vector<128xf32>
    %16 = vector.multi_reduction <add>, %14, %cst_12 [1] : vector<128x128xf32> to vector<128xf32>
    %17 = vector.shape_cast %16 : vector<128xf32> to vector<128x1xf32>
    %18 = arith.addf %15, %17 : vector<128x1xf32>
    %c0_13 = arith.constant 0 : index
    %c0_14 = arith.constant 0 : index
    %19 = vector.load %arg6[%c0_13, %c0_14] : memref<128x1xf32, #tpu.memory_space<vmem>>, vector<128x1xf32>
    tpu.vector_store %arg6[%c0_13, %c0_14], %18 {strides = array<i32>} : memref<128x1xf32, #tpu.memory_space<vmem>>, vector<128x1xf32>,
    %c1_i32 = arith.constant 1 : i32
    %20 = arith.cmpi eq, %arg1, %c1_i32 : i32
    %21 = arith.extui %20 : i1 to i32
    %c0_i32_15 = arith.constant 0 : i32
    %22 = arith.cmpi ne, %21, %c0_i32_15 : i32
    scf.if %22 {
      %c0_16 = arith.constant 0 : index
      %c0_17 = arith.constant 0 : index
      %23 = vector.load %arg6[%c0_16, %c0_17] : memref<128x1xf32, #tpu.memory_space<vmem>>, vector<128x1xf32>
      %cst_18 = arith.constant 3.906250e-03 : f32
      %24 = vector.broadcast %cst_18 : f32 to vector<128x1xf32>
      %25 = arith.mulf %23, %24 : vector<128x1xf32>
      %c0_19 = arith.constant 0 : index
      %c33 = arith.constant 33 : index
      %26 = vector.load %arg4[%c0_19, %c33] : memref<128x49xf32, #tpu.memory_space<vmem>>, vector<128x8xf32>
      %c0_20 = arith.constant 0 : index
      %c41 = arith.constant 41 : index
      %27 = vector.load %arg4[%c0_20, %c41] : memref<128x49xf32, #tpu.memory_space<vmem>>, vector<128x8xf32>
      %28 = vector.broadcast %25 : vector<128x1xf32> to vector<128x8xf32>
      %29 = arith.mulf %28, %26 : vector<128x8xf32>
      %cst_21 = arith.constant dense<0.000000e+00> : vector<8xf32>
      %30 = vector.multi_reduction <add>, %29, %cst_21 [0] : vector<128x8xf32> to vector<8xf32>
      %31 = vector.shape_cast %30 : vector<8xf32> to vector<1x8xf32>
      %cst_22 = arith.constant 0.000000e+00 : f32
      %32 = vector.broadcast %cst_22 : f32 to vector<1x8xf32>
      %33 = arith.maximumf %31, %32 : vector<1x8xf32>
      %34 = vector.broadcast %33 : vector<1x8xf32> to vector<128x8xf32>
      %35 = arith.mulf %27, %34 : vector<128x8xf32>
      %cst_23 = arith.constant dense<0.000000e+00> : vector<128xf32>
      %36 = vector.multi_reduction <add>, %35, %cst_23 [1] : vector<128x8xf32> to vector<128xf32>
      %37 = vector.shape_cast %36 : vector<128xf32> to vector<128x1xf32>
      %cst_24 = arith.constant 0.000000e+00 : f32
      %38 = vector.broadcast %cst_24 : f32 to vector<128x1xf32>
      %39 = arith.subf %38, %37 : vector<128x1xf32>
      %40 = math.exp %39 : vector<128x1xf32>
      %cst_25 = arith.constant 1.000000e+00 : f32
      %41 = vector.broadcast %cst_25 : f32 to vector<128x1xf32>
      %42 = arith.addf %41, %40 : vector<128x1xf32>
      %cst_26 = arith.constant 1.000000e+00 : f32
      %43 = vector.broadcast %cst_26 : f32 to vector<128x1xf32>
      %44 = arith.divf %43, %42 : vector<128x1xf32>
      %c0_27 = arith.constant 0 : index
      %c0_28 = arith.constant 0 : index
      %c0_29 = arith.constant 0 : index
      %45 = vector.load %arg5[%c0_27, %c0_28, %c0_29] : memref<1x128x1xf32, #tpu.memory_space<vmem>>, vector<1x128x1xf32>
      %46 = vector.shape_cast %45 : vector<1x128x1xf32> to vector<128x1xf32>
      %47 = vector.shape_cast %44 : vector<128x1xf32> to vector<1x128x1xf32>
      tpu.vector_store %arg5[%c0_27, %c0_28, %c0_29], %47 {strides = array<i32>} : memref<1x128x1xf32, #tpu.memory_space<vmem>>, vector<1x128x1xf32>,
    } else {
    }
    return
  }
  func.func @transform_0(%arg0: i32, %arg1: i32) -> (i32, i32, i32) {
    %c0_i32 = arith.constant 0 : i32
    %c0_i32_0 = arith.constant 0 : i32
    return %arg0, %c0_i32, %arg1 : i32, i32, i32
  }
  func.func @transform_1(%arg0: i32, %arg1: i32) -> (i32, i32, i32) {
    %c0_i32 = arith.constant 0 : i32
    %c0_i32_0 = arith.constant 0 : i32
    return %arg0, %c0_i32, %arg1 : i32, i32, i32
  }
  func.func @transform_2(%arg0: i32, %arg1: i32) -> (i32, i32) {
    %c0_i32 = arith.constant 0 : i32
    %c0_i32_0 = arith.constant 0 : i32
    %c0_i32_1 = arith.constant 0 : i32
    return %c0_i32, %c0_i32_0 : i32, i32
  }
  func.func @transform_3(%arg0: i32, %arg1: i32) -> (i32, i32, i32) {
    %c0_i32 = arith.constant 0 : i32
    %c0_i32_0 = arith.constant 0 : i32
    %c0_i32_1 = arith.constant 0 : i32
    return %arg0, %c0_i32, %c0_i32_0 : i32, i32, i32
  }
}

</mosaic_0001>

<bundles_post_ra>
// kernel: tpu_custom_call.1
= control target key start
LH: loop header
LB: loop body
LE: loop exit
PB: predicated region body
PF: predicated region fallthrough
CT: control target
= control target key end

     0   :  { %8 = vsyncpa [#allocation5], 0  ;;  %s2003_s0 = inlined_call_operand.vmem [shape: f32[2,32,256], index: 0, kind: input, shape index: {}]   ;;  %s2004_s1 = inlined_call_operand.hbm [shape: f32[2,32,256], index: 1, kind: input, shape index: {}]   ;;  %s2005_s2 = inlined_call_operand.vmem [shape: f32[128,49], index: 2, kind: input, shape index: {}]   ;;  %s2006_s3 = inlined_call_operand.vmem [shape: f32[2,128,1], index: 3, kind: output, shape index: {}]  }
   0x1   :  { %10 = vsyncpa [#allocation5 + $0x1], 0  ;;  %s1579_s12 = smov 0   ;;  %s1581_s13 = smov 0  }
   0x2   :  { %s1583_s14 = smov 0   ;;  %s1585_s15 = smov 0  }
   0x3   :  { %s1587_s16 = smov 0   ;;  %s1589_s17 = smov 0  }
   0x4   :  { %s1591_s18 = smov 0   ;;  %s1593_s19 = smov 0  }
   0x5 LB: > { %s25_s20 = sadd.s32 1, %s1540_s17  ;;  %s28_s21 = sadd.s32 1, %s1544_s18  ;;  %s1548_s19 = sphi %s1593_s19, %s16_s19   ;;  %s1544_s18 = sphi %s1591_s18, %s2015_s18   ;;  %s1540_s17 = sphi %s1589_s17, %s2014_s17   ;;  %s1536_s16 = sphi %s1587_s16, %s2013_s16   ;;  %s1532_s15 = sphi %s1585_s15, %s2012_s15   ;;  %s1528_s14 = sphi %s1583_s14, %s2011_s14   ;;  %s1524_s13 = sphi %s1581_s13, %s2010_s13   ;;  %s1520_s12 = sphi %s1579_s12, %s2009_s12  }
   0x6   : > { %p26_p0 = scmp.ge.s32.totalorder %s25_s20, 2  ;;  %s1212_s22 = sadd.s32 4294967295, %s1548_s19  }
   0x7   : > { %p44_p1 = scmp.ne.s32.totalorder %s1528_s14, %s1524_s13  ;;  %p45_p2 = scmp.eq.s32.totalorder %s1548_s19, 0 }
   0x8   : > { %s2017_s20 = smov (%p26_p0, %s25_s20), 0  ;;  %s2019_s21 = smov (!%p26_p0, %s28_s21), %s1544_s18 }
   0x9   : > { %s33_s23 = ssub.s32 %s1540_s17, %s2017_s20  ;;  %p30_p3 = scmp.ge.s32.totalorder %s2019_s21, 2 }
   0xa   : > { %p78_p4 = scmp.ne.s32.totalorder %s1524_s13, %s1520_s12  ;;  %p1629_p5 = por %p45_p2, %p44_p1 }
   0xb   : > { %p79_p6 = scmp.eq.s32.totalorder %s1212_s22, 0  ;;  %s2021_s21 = smov (%p30_p3, %s2019_s21), 0 }
   0xc   : > { %s32_s26 = ssub.s32 %s1544_s18, %s2021_s21  ;;  %s37_s28 = sadd.s32 1, %s1528_s14 }
   0xd   : > { %p1635_p7 = por %p79_p6, %p78_p4  ;;  %s34_s27 = sor.u32 %s33_s23, %s32_s26 }
   0xe   : > { %p35_p8 = scmp.eq.s32.totalorder %s34_s27, 0  ;;  %p1215_p9 = scmp.ge.s32.totalorder %s1548_s19, 4 }
  0x10   : > { %s1643_s29 = scalar_select %p35_p8, %s1528_s14, %s37_s28  }
  0x11   : > { %148 = sbr.rel (%p1215_p9) target bundleno = 60 (0x3c), region = 20 }
  0x18   : > { %151 = sbr.rel (!%p1629_p5) target bundleno = 32 (0x20), region = 24  ;;  %s153_s30 = sand.u32 (%p1629_p5), 1, %s1528_s14  }
  0x19   : > { %s1217_s4 = sshll.u32 (%p1629_p5), %s1544_s18, 3  ;;  %s1216_s5 = sshll.u32 (%p1629_p5), %s153_s30, 5 }
  0x1a   : > { %s157_s6 = sadd.s32 (%p1629_p5), %s1540_s17, %s1217_s4  ;;  %s155_s11 = scalar_lea.vmem (%p1629_p5), [#allocation3], %s1216_s5 }
  0x1b   : > { %s1218_s7 = sshll.u32 (%p1629_p5), %s157_s6, 3 }
  0x1c   : > { %s159_s10 = scalar_lea.vmem (%p1629_p5), %s2003_s0, %s1218_s7 }
  0x1d   : > { %v193_v0 = vld [vmem:[%s159_s10] sm:$0xff] (%p1629_p5)  ;;  %v195_v1 = vld [vmem:[%s159_s10 + $0x10] sm:$0xff] (%p1629_p5) }
  0x1e   : > { %v197_v2 = vld [vmem:[%s159_s10 + $0x20] sm:$0xff] (%p1629_p5)  ;;  %194 = vst [vmem:[%s155_s11] sm:$0xff] (%p1629_p5), %v193_v0  ;;  %196 = vst [vmem:[%s155_s11 + $0x8] sm:$0xff] (%p1629_p5), %v195_v1  ;;  %v199_v3 = vld [vmem:[%s159_s10 + $0x30] sm:$0xff] (%p1629_p5) }
  0x1f   : > { %198 = vst [vmem:[%s155_s11 + $0x10] sm:$0xff] %v197_v2  ;;  %200 = vst [vmem:[%s155_s11 + $0x18] sm:$0xff] %v199_v3 }
  0x20 PF: > { %s207_s12 = sand.u32 1, %s1528_s14   ;;  %s1220_s22 = sshll.u32 %s1544_s18, 3 }
  0x21   : > { %s1219_s23 = sshll.u32 %s207_s12, 5  ;;  %s216_s26 = sadd.s32 %s1540_s17, %s1220_s22 }
  0x22   : > { %s1221_s27 = sshll.u32 %s216_s26, 7  ;;  %s211_s28 = scalar_lea.vmem [#allocation4], %s1219_s23 }
  0x23   : > { %s219_s30 = sshll.u32 %s211_s28, 4  ;;  %s1660_s5 = scalar_lea.hbm %s2004_s1, %s1221_s27  ;;  %s1662_s30 = int_to_ptr.vmem [resolvable:$true] %s219_s30 }
  0x24   : > { %s1664_s7 = scalar_lea.sflag [#allocation5], %s207_s12  ;;  %s1454_s8 = scalar_lea.hbm %s1660_s5, 512 }
  0x25   : > { %p1455_p10 = scmp.ne.s32.totalorder %s1660_s5, %s1454_s8  ;;  %s1458_s11 = scalar_lea.hbm %s2004_s1, 2048 }
  0x26   : > { %p1459_p13 = scmp.lt.u32.totalorder %s1660_s5, %s2004_s1  ;;  %p1460_p0 = scmp.lt.u32.totalorder %s1458_s11, %s1454_s8 }
  0x27   : > { %p1456_p11 = pnand %p1455_p10, %p1629_p5  ;;  %p1462_p2 = scmp.lt.u32.totalorder %s1454_s8, %s1660_s5 }
  0x28   : > { %p1461_p1 = por %p1460_p0, %p1459_p13 }
  0x29   : > { %p1457_p12 = pneg %p1456_p11 }
  0x2a   : > { %p1463_p3 = por %p1462_p2, %p1461_p1 }
  0x2c   : > { %p1464_p4 = pnand %p1463_p3, %p1457_p12 }
  0x2e   : > { %1467 = shalt.err (!%p1464_p4)
}
  0x2f   : > { %s1468_s12 = scalar_lea.vmem %s1662_s30, 512  ;;  %s1550_s26 = smov [#allocation4]  }
  0x30   : > { %p1469_p6 = scmp.ne.s32.totalorder %s1662_s30, %s1468_s12  ;;  %s1472_s27 = sshll.u32 %s1550_s26, 4  ;;  %s1473_s27 = int_to_ptr.vmem [resolvable:$false] %s1472_s27 }
  0x31   : > { %s1474_s28 = scalar_lea.vmem %s1473_s27, 1024  ;;  %p1475_p10 = scmp.lt.s32.totalorder %s1662_s30, %s1473_s27 }
  0x32   : > { %p1470_p8 = pnand %p1469_p6, %p1629_p5  ;;  %p1476_p11 = scmp.lt.s32.totalorder %s1474_s28, %s1468_s12 }
  0x34   : > { %p1471_p9 = pneg %p1470_p8  ;;  %p1477_p13 = por %p1476_p11, %p1475_p10 }
  0x36   : > { %p1478_p0 = pnand %p1477_p13, %p1471_p9 }
  0x38   : > { %1481 = shalt.err (!%p1478_p0)
}
  0x39   : > { %s1551_s4 = smov 256   ;;  %s1552_s6 = smov 128  }
  0x3a   : > { %s1553_s8 = smov 8  }
  0x3b   : > { %1312 = dma.hbm_to_vmem [thread:$0]  (%p1629_p5), %s1660_s5, 512, %s1662_s30, %s1664_s7, %s1551_s4, %s1552_s6, %s1553_s8  }
  0x3c PF: > { %p1222_p12 = scmp.ge.s32.totalorder %s1548_s19, 1  ;;  %p227_p1 = scmp.lt.s32.totalorder %s1548_s19, 5 }
  0x3e   : > { %p228_p2 = pnand %p1222_p12, %p227_p1 }
  0x3f   : > { %s234_s9 = sand.u32 (!%p228_p2), 1, %s1524_s13  }
  0x40   : > { %231 = sbr.rel (%p228_p2) target bundleno = 1093 (0x445), region = 66  ;;  %s1223_s10 = sshll.u32 (!%p228_p2), %s234_s9, 5 }
  0x41   : > { %s1691_s11 = scalar_lea.vmem (!%p228_p2), [#allocation3], %s1223_s10  ;;  %s241_s22 = scalar_lea.sflag (!%p228_p2), [#allocation5], %s234_s9 }
  0x42   : > { %s1693_s23 = scalar_lea.vmem (!%p228_p2), [#allocation4], %s1223_s10 }
  0x47   : > { %1515 = dma.done.wait (%p1635_p7), %s241_s22, 512  }
  0x48   : > { %1517 = vsyncadd (%p1635_p7), %s241_s22, 4294966784  ;;  %p271_p5 = scmp.lt.s32.totalorder %s1536_s16, 1  ;;  %p1227_p3 = scmp.ne.s32.totalorder %s1532_s15, 0 }
  0x49   : > { %vm280_vm0 = vcmask (!%p1227_p3), 7168   ;;  %v1554_v4 = vmov (!%p1227_p3), 0.0  }
  0x4a   : > { %s2023_s16 = smov (!%p271_p5, %s1536_s16), 1  ;;  %279 = sbr.rel (%p1227_p3) target bundleno = 83 (0x53), region = 78 }
  0x4b   : > { %s1247_s24 = sshll.u32 %s2023_s16, 7  ;;  %281 = vst.msk [vmem:[#allocation2] sm:$0xff] (!%p1227_p3), %vm280_vm0, %v1554_v4  ;;  %282 = vst.msk [vmem:[#allocation2 + $0x8] sm:$0xff] (!%p1227_p3), %vm280_vm0, %v1554_v4 }
  0x4c   : > { %s1704_s7 = scalar_lea.vmem %s2006_s3, %s1247_s24  ;;  %283 = vst.msk [vmem:[#allocation2 + $0x10] sm:$0xff] (!%p1227_p3), %vm280_vm0, %v1554_v4  ;;  %284 = vst.msk [vmem:[#allocation2 + $0x18] sm:$0xff] (!%p1227_p3), %vm280_vm0, %v1554_v4 }
  0x4d   : > { %285 = vst.msk [vmem:[#allocation2 + $0x20] sm:$0xff] (!%p1227_p3), %vm280_vm0, %v1554_v4  ;;  %286 = vst.msk [vmem:[#allocation2 + $0x28] sm:$0xff] (!%p1227_p3), %vm280_vm0, %v1554_v4 }
  0x4e   : > { %287 = vst.msk [vmem:[#allocation2 + $0x30] sm:$0xff] (!%p1227_p3), %vm280_vm0, %v1554_v4  ;;  %288 = vst.msk [vmem:[#allocation2 + $0x38] sm:$0xff] (!%p1227_p3), %vm280_vm0, %v1554_v4 }
  0x4f   : > { %289 = vst.msk [vmem:[#allocation2 + $0x40] sm:$0xff] (!%p1227_p3), %vm280_vm0, %v1554_v4  ;;  %290 = vst.msk [vmem:[#allocation2 + $0x48] sm:$0xff] (!%p1227_p3), %vm280_vm0, %v1554_v4 }
  0x50   : > { %291 = vst.msk [vmem:[#allocation2 + $0x50] sm:$0xff] (!%p1227_p3), %vm280_vm0, %v1554_v4  ;;  %292 = vst.msk [vmem:[#allocation2 + $0x58] sm:$0xff] (!%p1227_p3), %vm280_vm0, %v1554_v4 }
  0x51   : > { %293 = vst.msk [vmem:[#allocation2 + $0x60] sm:$0xff] %vm280_vm0, %v1554_v4  ;;  %294 = vst.msk [vmem:[#allocation2 + $0x68] sm:$0xff] %vm280_vm0, %v1554_v4 }
  0x52   : > { %295 = vst.msk [vmem:[#allocation2 + $0x70] sm:$0xff] %vm280_vm0, %v1554_v4  ;;  %296 = vst.msk [vmem:[#allocation2 + $0x78] sm:$0xff] %vm280_vm0, %v1554_v4 }
  0x53 PF: > { %v297_v5 = vld [vmem:[%s1691_s11] sm:$0xff]  ;;  %v298_v6 = vld [vmem:[%s1691_s11 + $0x8] sm:$0xff]  ;;  %vm405_vm1 = vcmask 261120   ;;  %v299_v10 = vld [vmem:[%s1691_s11 + $0x10] sm:$0xff]  ;;  %v1555_v12 = vmov 32   ;;  %vm663_vm2 = vcmask 7168  }
  0x54   : > { %v301_v7 = vld [vmem:[%s1693_s23] sm:$0xff]  ;;  %v302_v8 = vld [vmem:[%s1693_s23 + $0x8] sm:$0xff]  ;;  %v300_v11 = vld [vmem:[%s1691_s11 + $0x18] sm:$0xff]  ;;  %1387 = vset.pattern.permute.xlu1 %v1555_v12  ;;  %1386 = vset.pattern.permute.xlu0 %v1555_v12  ;;  %p1244_p7 = scmp.ne.s32.totalorder %s1532_s15, 1 }
  0x55   : > { %v305_v9 = vadd.f32 %v301_v7, %v297_v5  ;;  %v306_v13 = vadd.f32 %v302_v8, %v298_v6  ;;  %v303_v14 = vld [vmem:[%s1693_s23 + $0x10] sm:$0xff]  ;;  %v304_v15 = vld [vmem:[%s1693_s23 + $0x18] sm:$0xff]  ;;  %v309_v16 = vld [vmem:[%s2005_s2] sm:$0xff]  ;;  %vm828_vm3 = vcmask (!%p1244_p7), 335112   ;;  %s1557_s11 = smov (!%p1244_p7), 8   ;;  %s1558_s22 = smov (!%p1244_p7), 87  }
  0x56   : > { %v307_v17 = vadd.f32 %v303_v14, %v299_v10  ;;  %v308_v18 = vadd.f32 %v304_v15, %v300_v11  ;;  %1276 = vmatprep.mubr.msk.f32.mxu0 %vm405_vm1, %v309_v16  ;;  %v317_v19 = vld [vmem:[%s2005_s2 + $0x40] sm:$0xff]  ;;  %327 = vperm.xlu0 %1386, %v309_v16   ;;  %v311_v21 = vld [vmem:[%s2005_s2 + $0x10] sm:$0xff]  ;;  %v310_v23 = vld [vmem:[%s2005_s2 + $0x8] sm:$0xff]  ;;  %vm951_vm4 = vcmask (!%p1244_p7), 64512  }
  0x57   : > { %v1300_v20 = vpack.c.bf16 %v306_v13, %v305_v9  ;;  %1288 = vmatprep.mubr.msk.f32.mxu1 %vm405_vm1, %v317_v19  ;;  %337 = vperm.xlu1 %1387, %v311_v21   ;;  %v312_v24 = vld [vmem:[%s2005_s2 + $0x18] sm:$0xff]  ;;  %v318_v25 = vld [vmem:[%s2005_s2 + $0x48] sm:$0xff]  ;;  %v319_v26 = vld [vmem:[%s2005_s2 + $0x50] sm:$0xff] }
  0x58   : > { %v1304_v22 = vpack.c.bf16 %v308_v18, %v307_v17  ;;  %v313_v27 = vld [vmem:[%s2005_s2 + $0x20] sm:$0xff]  ;;  %v314_v28 = vld [vmem:[%s2005_s2 + $0x28] sm:$0xff]  ;;  %v320_v29 = vld [vmem:[%s2005_s2 + $0x58] sm:$0xff] }
  0x59   : > { %1301 = vmatprep.subr.bf16.mxu0 %v1300_v20  ;;  %1308 = vmatprep.subr.bf16.mxu1 %v1300_v20  ;;  %v321_v30 = vld [vmem:[%s2005_s2 + $0x60] sm:$0xff]  ;;  %v315_v31 = vld [vmem:[%s2005_s2 + $0x30] sm:$0xff]  ;;  %v316_v32 = vld [vmem:[%s2005_s2 + $0x38] sm:$0xff] }
  0x5a   : > { %1303 = vmatpush3.bf16.msra.mxu0 %v1300_v20  ;;  %1310 = vmatpush3.bf16.msra.mxu1 %v1300_v20  ;;  %v322_v33 = vld [vmem:[%s2005_s2 + $0x68] sm:$0xff]  ;;  %v323_v34 = vld [vmem:[%s2005_s2 + $0x70] sm:$0xff]  ;;  %v324_v35 = vld [vmem:[%s2005_s2 + $0x78] sm:$0xff] }
  0x5b   : > { %1305 = vmatprep.subr.bf16.mxu0 %v1304_v22  ;;  %1309 = vmatprep.subr.bf16.mxu1 %v1304_v22 }
  0x5c   : > { %342 = vperm.xlu1 %1387, %v312_v24   ;;  %332 = vperm.xlu0 %1386, %v310_v23  }
  0x5e   : > { %1307 = vmatpush3.bf16.msra.mxu0 %v1304_v22  ;;  %1311 = vmatpush3.bf16.msra.mxu1 %v1304_v22 }
  0x60   : > { %352 = vperm.xlu1 %1387, %v314_v28   ;;  %347 = vperm.xlu0 %1386, %v313_v27  }
  0x61   : > { %1277 = vmatmul.mubr.msk.f32.vlgmr.msra.gmra.mrb[0].mxu0 %vm405_vm1, %v310_v23  ;;  %1289 = vmatmul.mubr.msk.f32.vlgmr.msra.gmra.mrb[0].mxu1 %vm405_vm1, %v318_v25 }
  0x62   : > { %1279 = vmatprep.mubr.msk.f32.mxu0 %vm405_vm1, %v311_v21  ;;  %1291 = vmatprep.mubr.msk.f32.mxu1 %vm405_vm1, %v319_v26 }
  0x64   : > { %362 = vperm.xlu1 %1387, %v316_v32   ;;  %357 = vperm.xlu0 %1386, %v315_v31  }
  0x65   : > { %1280 = vmatmul.mubr.msk.f32.gmra.mrb[2].mxu0 %vm405_vm1, %v312_v24  ;;  %1292 = vmatmul.mubr.msk.f32.gmra.mrb[2].mxu1 %vm405_vm1, %v320_v29 }
  0x66   : > { %1282 = vmatprep.mubr.msk.f32.mxu0 %vm405_vm1, %v313_v27  ;;  %1294 = vmatprep.mubr.msk.f32.mxu1 %vm405_vm1, %v321_v30 }
  0x68   : > { %372 = vperm.xlu1 %1387, %v318_v25   ;;  %367 = vperm.xlu0 %1386, %v317_v19  }
  0x69   : > { %1283 = vmatmul.mubr.msk.f32.gmra.mrb[4].mxu0 %vm405_vm1, %v314_v28  ;;  %1295 = vmatmul.mubr.msk.f32.gmra.mrb[4].mxu1 %vm405_vm1, %v322_v33 }
  0x6a   : > { %1285 = vmatprep.mubr.msk.f32.mxu0 %vm405_vm1, %v315_v31  ;;  %1297 = vmatprep.mubr.msk.f32.mxu1 %vm405_vm1, %v323_v34 }
  0x6c   : > { %382 = vperm.xlu1 %1387, %v320_v29   ;;  %377 = vperm.xlu0 %1386, %v319_v26  }
  0x6d   : > { %1286 = vmatmul.mubr.msk.f32.gmra.mrb[6].mxu0 %vm405_vm1, %v316_v32  ;;  %1298 = vmatmul.mubr.msk.f32.gmra.mrb[6].mxu1 %vm405_vm1, %v324_v35 }
  0x70   : > { %392 = vperm.xlu1 %1387, %v322_v33   ;;  %387 = vperm.xlu0 %1386, %v321_v30  }
  0x74   : > { %402 = vperm.xlu1 %1387, %v324_v35   ;;  %397 = vperm.xlu0 %1386, %v323_v34  }
  0xd5   : > { %v328_v37 = vpop.permute.xlu0 %327 }
  0xd6   : > { %v338_v36 = vpop.permute.xlu1 %337 }
  0xdb   : > { %v343_v38 = vpop.permute.xlu1 %342  ;;  %v333_v39 = vpop.permute.xlu0 %332 }
  0xdf   : > { %v353_v40 = vpop.permute.xlu1 %352  ;;  %v348_v41 = vpop.permute.xlu0 %347 }
  0xe3   : > { %v1795_v42 = vpop.permute.xlu1 %362  ;;  %v358_v43 = vpop.permute.xlu0 %357 }
  0xe7   : > { %v373_v44 = vpop.permute.xlu1 %372  ;;  %v368_v45 = vpop.permute.xlu0 %367 }
  0xeb   : > { %v378_v60 = vpop.permute.xlu0 %377  ;;  %v383_v5 = vpop.permute.xlu1 %382 }
  0xef   : > { %v388_v14 = vpop.permute.xlu0 %387  ;;  %v393_v23 = vpop.permute.xlu1 %392 }
  0xf3   : > { %v398_v24 = vpop.permute.xlu0 %397  ;;  %v403_v32 = vpop.permute.xlu1 %402 }
 0x134   : > { %v1278_v46 = vpop.f32.mrb[0].mxu0  ;;  %v1290_v47 = vpop.f32.mrb[0].mxu1 }
 0x135   : > { %v510_v48 = vadd.f32 %v1278_v46, %v333_v39  ;;  %v550_v49 = vadd.f32 %v1290_v47, %v373_v44  ;;  %v504_v50 = vpop.f32.mrb[1].mxu0  ;;  %v544_v51 = vpop.f32.mrb[1].mxu1  ;;  %v599_v44 = vld [vmem:[#allocation2] sm:$0xff] }
 0x136   : > { %v505_v54 = vadd.f32 %v504_v50, %v328_v37  ;;  %v545_v55 = vadd.f32 %v544_v51, %v368_v45  ;;  %v600_v37 = vld [vmem:[#allocation2 + $0x8] sm:$0xff] }
 0x137   : > { %v584_v52 = vmax.f32 %v510_v48, 0.0  ;;  %v592_v53 = vmax.f32 %v550_v49, 0.0  ;;  %v609_v48 = vld [vmem:[#allocation2 + $0x50] sm:$0xff]  ;;  %v602_v49 = vld [vmem:[#allocation2 + $0x18] sm:$0xff] }
 0x138   : > { %v1281_v56 = vpop.f32.mrb[2].mxu0  ;;  %v1293_v57 = vpop.f32.mrb[2].mxu1  ;;  %v583_v61 = vmax.f32 %v505_v54, 0.0  ;;  %v591_v62 = vmax.f32 %v545_v55, 0.0  ;;  %v603_v54 = vld [vmem:[#allocation2 + $0x20] sm:$0xff]  ;;  %v610_v55 = vld [vmem:[#allocation2 + $0x58] sm:$0xff] }
 0x139   : > { %633 = vadd.xlane.f32.xlu0 %v592_v53  ;;  %v554_v58 = vpop.f32.mrb[3].mxu1  ;;  %617 = vadd.xlane.f32.xlu1 %v584_v52  ;;  %v514_v59 = vpop.f32.mrb[3].mxu0  ;;  %v520_v63 = vadd.f32 %v1281_v56, %v343_v38  ;;  %v560_v7 = vadd.f32 %v1293_v57, %v383_v5 }
 0x13a   : > { %v555_v0 = vadd.f32 %v554_v58, %v378_v60  ;;  %v515_v16 = vadd.f32 %v514_v59, %v338_v36  ;;  %v608_v36 = vld [vmem:[#allocation2 + $0x48] sm:$0xff]  ;;  %v611_v60 = vld [vmem:[#allocation2 + $0x60] sm:$0xff] }
 0x13b   : > { %v586_v6 = vmax.f32 %v520_v63, 0.0  ;;  %v594_v15 = vmax.f32 %v560_v7, 0.0 }
 0x13c   : > { %v1284_v1 = vpop.f32.mrb[4].mxu0  ;;  %v1296_v2 = vpop.f32.mrb[4].mxu1  ;;  %v593_v8 = vmax.f32 %v555_v0, 0.0  ;;  %v585_v19 = vmax.f32 %v515_v16, 0.0 }
 0x13d   : > { %v564_v3 = vpop.f32.mrb[5].mxu1  ;;  %631 = vadd.xlane.f32.xlu1 %v591_v62  ;;  %v524_v4 = vpop.f32.mrb[5].mxu0  ;;  %615 = vadd.xlane.f32.xlu0 %v583_v61  ;;  %v530_v20 = vadd.f32 %v1284_v1, %v353_v40  ;;  %v570_v26 = vadd.f32 %v1296_v2, %v393_v23  ;;  %v601_v61 = vld [vmem:[#allocation2 + $0x10] sm:$0xff]  ;;  %v1556_v23 = vmov (!%p1244_p7), 0  }
 0x13e   : > { %v525_v9 = vadd.f32 %v524_v4, %v348_v41  ;;  %v565_v17 = vadd.f32 %v564_v3, %v388_v14  ;;  %v605_v2 = vld [vmem:[#allocation2 + $0x30] sm:$0xff]  ;;  %v604_v3 = vld [vmem:[#allocation2 + $0x28] sm:$0xff]  ;;  %v606_v14 = vld [vmem:[#allocation2 + $0x38] sm:$0xff]  ;;  %1389 = vset.pattern.permute.xlu1 (!%p1244_p7), %v1556_v23  ;;  %1388 = vset.pattern.permute.xlu0 (!%p1244_p7), %v1556_v23 }
 0x13f   : > { %v588_v25 = vmax.f32 %v530_v20, 0.0  ;;  %v596_v29 = vmax.f32 %v570_v26, 0.0 }
 0x140   : > { %v1287_v10 = vpop.f32.mrb[6].mxu0  ;;  %v1299_v11 = vpop.f32.mrb[6].mxu1  ;;  %v587_v18 = vmax.f32 %v525_v9, 0.0  ;;  %v595_v21 = vmax.f32 %v565_v17, 0.0  ;;  %v612_v9 = vld [vmem:[#allocation2 + $0x68] sm:$0xff]  ;;  %v614_v17 = vld [vmem:[#allocation2 + $0x78] sm:$0xff] }
 0x141   : > { %v574_v12 = vpop.f32.mrb[7].mxu1  ;;  %635 = vadd.xlane.f32.xlu1 %v593_v8  ;;  %v534_v13 = vpop.f32.mrb[7].mxu0  ;;  %621 = vadd.xlane.f32.xlu0 %v586_v6  ;;  %v540_v30 = vadd.f32 %v1287_v10, %v1795_v42  ;;  %v580_v34 = vadd.f32 %v1299_v11, %v403_v32  ;;  %v613_v8 = vld [vmem:[#allocation2 + $0x70] sm:$0xff] }
 0x142   : > { %v535_v22 = vadd.f32 %v534_v13, %v358_v43  ;;  %v575_v27 = vadd.f32 %v574_v12, %v398_v24  ;;  %v607_v43 = vld [vmem:[#allocation2 + $0x40] sm:$0xff] }
 0x143   : > { %v590_v33 = vmax.f32 %v540_v30, 0.0  ;;  %v598_v35 = vmax.f32 %v580_v34, 0.0 }
 0x144   : > { %v589_v28 = vmax.f32 %v535_v22, 0.0  ;;  %v597_v31 = vmax.f32 %v575_v27, 0.0 }
 0x145   : > { %623 = vadd.xlane.f32.xlu1 %v587_v18  ;;  %637 = vadd.xlane.f32.xlu0 %v594_v15 }
 0x149   : > { %639 = vadd.xlane.f32.xlu1 %v595_v21  ;;  %619 = vadd.xlane.f32.xlu0 %v585_v19 }
 0x14d   : > { %627 = vadd.xlane.f32.xlu1 %v589_v28  ;;  %625 = vadd.xlane.f32.xlu0 %v588_v25 }
 0x151   : > { %643 = vadd.xlane.f32.xlu1 %v597_v31  ;;  %641 = vadd.xlane.f32.xlu0 %v596_v29 }
 0x155   : > { %629 = vadd.xlane.f32.xlu0 %v590_v33 }
 0x159   : > { %645 = vadd.xlane.f32.xlu0 %v598_v35 }
 0x1c6   : > { %v634_v38 = vpop.xlane.xlu0 %633  ;;  %v618_v39 = vpop.xlane.xlu1 %617 }
 0x1c7   : > { %v656_v40 = vadd.f32 %v634_v38, %v608_v36  ;;  %v648_v41 = vadd.f32 %v618_v39, %v600_v37 }
 0x1c9   : > { %673 = vst.msk [vmem:[#allocation2 + $0x48] sm:$0xff] %vm663_vm2, %v656_v40  ;;  %665 = vst.msk [vmem:[#allocation2 + $0x8] sm:$0xff] %vm663_vm2, %v648_v41 }
 0x1ca   : > { %v632_v42 = vpop.xlane.xlu1 %631  ;;  %v616_v45 = vpop.xlane.xlu0 %615 }
 0x1cb   : > { %v655_v46 = vadd.f32 %v632_v42, %v607_v43  ;;  %v647_v47 = vadd.f32 %v616_v45, %v599_v44 }
 0x1cd   : > { %672 = vst.msk [vmem:[#allocation2 + $0x40] sm:$0xff] %vm663_vm2, %v655_v46  ;;  %664 = vst.msk [vmem:[#allocation2] sm:$0xff] %vm663_vm2, %v647_v47 }
 0x1ce   : > { %v636_v50 = vpop.xlane.xlu1 %635  ;;  %v622_v51 = vpop.xlane.xlu0 %621 }
 0x1cf   : > { %v657_v52 = vadd.f32 %v636_v50, %v609_v48  ;;  %v650_v53 = vadd.f32 %v622_v51, %v602_v49 }
 0x1d0   : > { %v685_v26 = vld [vmem:[#allocation2 + $0x8] sm:$0xff] (!%p1244_p7) }
 0x1d1   : > { %674 = vst.msk [vmem:[#allocation2 + $0x50] sm:$0xff] %vm663_vm2, %v657_v52  ;;  %667 = vst.msk [vmem:[#allocation2 + $0x18] sm:$0xff] %vm663_vm2, %v650_v53  ;;  %v701_v28 = vmul.f32 (!%p1244_p7), 0.00390625, %v685_v26  ;;  %v693_v37 = vld [vmem:[#allocation2 + $0x48] sm:$0xff] (!%p1244_p7) }
 0x1d2   : > { %v624_v56 = vpop.xlane.xlu1 %623  ;;  %v638_v57 = vpop.xlane.xlu0 %637  ;;  %v709_v39 = vmul.f32 (!%p1244_p7), 0.00390625, %v693_v37 }
 0x1d3   : > { %v651_v58 = vadd.f32 %v624_v56, %v603_v54  ;;  %v658_v59 = vadd.f32 %v638_v57, %v610_v55  ;;  %v1818_v54 = vld [vmem:[%s2005_s2] sm:$0xff] (!%p1244_p7)  ;;  %v1823_v56 = vld [vmem:[%s2005_s2 + $0x10] sm:$0xff] (!%p1244_p7)  ;;  %v1828_v57 = vld [vmem:[%s2005_s2 + $0x8] sm:$0xff] (!%p1244_p7) }
 0x1d4   : > { %v684_v21 = vld [vmem:[#allocation2] sm:$0xff] (!%p1244_p7) }
 0x1d5   : > { %668 = vst.msk [vmem:[#allocation2 + $0x20] sm:$0xff] %vm663_vm2, %v651_v58  ;;  %675 = vst.msk [vmem:[#allocation2 + $0x58] sm:$0xff] %vm663_vm2, %v658_v59  ;;  %v700_v25 = vmul.f32 (!%p1244_p7), 0.00390625, %v684_v21  ;;  %v692_v38 = vld [vmem:[#allocation2 + $0x40] sm:$0xff] (!%p1244_p7)  ;;  %v1834_v59 = vld [vmem:[%s2005_s2 + $0x18] sm:$0xff] (!%p1244_p7) }
 0x1d6   : > { %v640_v62 = vpop.xlane.xlu1 %639  ;;  %v620_v63 = vpop.xlane.xlu0 %619  ;;  %v708_v40 = vmul.f32 (!%p1244_p7), 0.00390625, %v692_v38  ;;  %v1870_v21 = vld [vmem:[%s2005_s2 + $0x40] sm:$0xff] (!%p1244_p7) }
 0x1d7   : > { %v659_v0 = vadd.f32 %v640_v62, %v611_v60  ;;  %v649_v1 = vadd.f32 %v620_v63, %v601_v61  ;;  %734 = vperm.xlu0 (!%p1244_p7), %1388, %v700_v25   ;;  %v1877_v25 = vld [vmem:[%s2005_s2 + $0x48] sm:$0xff] (!%p1244_p7) }
 0x1d8   : > { %v687_v22 = vld [vmem:[#allocation2 + $0x18] sm:$0xff] (!%p1244_p7)  ;;  %v694_v43 = vld [vmem:[#allocation2 + $0x50] sm:$0xff] (!%p1244_p7) }
 0x1d9   : > { %676 = vst.msk [vmem:[#allocation2 + $0x60] sm:$0xff] %vm663_vm2, %v659_v0  ;;  %666 = vst.msk [vmem:[#allocation2 + $0x10] sm:$0xff] %vm663_vm2, %v649_v1  ;;  %v703_v27 = vmul.f32 (!%p1244_p7), 0.00390625, %v687_v22  ;;  %v710_v42 = vmul.f32 (!%p1244_p7), 0.00390625, %v694_v43  ;;  %v1841_v0 = vld [vmem:[%s2005_s2 + $0x20] sm:$0xff] (!%p1244_p7) }
 0x1da   : > { %v628_v4 = vpop.xlane.xlu1 %627  ;;  %v626_v5 = vpop.xlane.xlu0 %625 }
 0x1db   : > { %v653_v6 = vadd.f32 %v628_v4, %v605_v2  ;;  %v652_v7 = vadd.f32 %v626_v5, %v604_v3  ;;  %739 = vperm.xlu0 (!%p1244_p7), %1388, %v701_v28   ;;  %v1849_v5 = vld [vmem:[%s2005_s2 + $0x28] sm:$0xff] (!%p1244_p7) }
 0x1dc   : > { %v688_v30 = vld [vmem:[#allocation2 + $0x20] sm:$0xff] (!%p1244_p7)  ;;  %v695_v41 = vld [vmem:[#allocation2 + $0x58] sm:$0xff] (!%p1244_p7) }
 0x1dd   : > { %670 = vst.msk [vmem:[#allocation2 + $0x30] sm:$0xff] %vm663_vm2, %v653_v6  ;;  %669 = vst.msk [vmem:[#allocation2 + $0x28] sm:$0xff] %vm663_vm2, %v652_v7  ;;  %v704_v32 = vmul.f32 (!%p1244_p7), 0.00390625, %v688_v30  ;;  %v711_v44 = vmul.f32 (!%p1244_p7), 0.00390625, %v695_v41  ;;  %v1898_v41 = vld [vmem:[%s2005_s2 + $0x60] sm:$0xff] (!%p1244_p7) }
 0x1de   : > { %v644_v10 = vpop.xlane.xlu1 %643  ;;  %v642_v11 = vpop.xlane.xlu0 %641 }
 0x1df   : > { %v661_v12 = vadd.f32 %v644_v10, %v613_v8  ;;  %v660_v13 = vadd.f32 %v642_v11, %v612_v9  ;;  %754 = vperm.xlu0 (!%p1244_p7), %1388, %v704_v32   ;;  %v1856_v11 = vld [vmem:[%s2005_s2 + $0x30] sm:$0xff] (!%p1244_p7) }
 0x1e0   : > { %v686_v20 = vld [vmem:[#allocation2 + $0x10] sm:$0xff] (!%p1244_p7)  ;;  %v696_v46 = vld [vmem:[#allocation2 + $0x60] sm:$0xff] (!%p1244_p7) }
 0x1e1   : > { %678 = vst.msk [vmem:[#allocation2 + $0x70] sm:$0xff] %vm663_vm2, %v661_v12  ;;  %677 = vst.msk [vmem:[#allocation2 + $0x68] sm:$0xff] %vm663_vm2, %v660_v13  ;;  %v702_v24 = vmul.f32 (!%p1244_p7), 0.00390625, %v686_v20  ;;  %v712_v48 = vmul.f32 (!%p1244_p7), 0.00390625, %v696_v46 }
 0x1e2   : > { %v630_v15 = vpop.xlane.xlu0 %629 }
 0x1e3   : > { %v654_v16 = vadd.f32 %v630_v15, %v606_v14  ;;  %683 = sbr.rel (%p1244_p7) target bundleno = 1093 (0x445), region = 82  ;;  %744 = vperm.xlu1 (!%p1244_p7), %1389, %v702_v24   ;;  %v1863_v15 = vld [vmem:[%s2005_s2 + $0x38] sm:$0xff] (!%p1244_p7) }
 0x1e4   : > { %v689_v29 = vld [vmem:[#allocation2 + $0x28] sm:$0xff] (!%p1244_p7)  ;;  %v690_v34 = vld [vmem:[#allocation2 + $0x30] sm:$0xff] (!%p1244_p7) }
 0x1e5   : > { %671 = vst.msk [vmem:[#allocation2 + $0x38] sm:$0xff] %vm663_vm2, %v654_v16  ;;  %v705_v31 = vmul.f32 (!%p1244_p7), 0.00390625, %v689_v29  ;;  %v706_v36 = vmul.f32 (!%p1244_p7), 0.00390625, %v690_v34 }
 0x1e6   : > { %v646_v18 = vpop.xlane.xlu0 %645 }
 0x1e7   : > { %v662_v19 = vadd.f32 %v646_v18, %v614_v17  ;;  %749 = vperm.xlu1 (!%p1244_p7), %1389, %v703_v27   ;;  %764 = vperm.xlu0 (!%p1244_p7), %1388, %v706_v36  }
 0x1e8   : > { %v697_v45 = vld [vmem:[#allocation2 + $0x68] sm:$0xff] (!%p1244_p7)  ;;  %v698_v50 = vld [vmem:[#allocation2 + $0x70] sm:$0xff] (!%p1244_p7) }
 0x1e9   : > { %679 = vst.msk [vmem:[#allocation2 + $0x78] sm:$0xff] %vm663_vm2, %v662_v19  ;;  %v713_v47 = vmul.f32 (!%p1244_p7), 0.00390625, %v697_v45  ;;  %v714_v52 = vmul.f32 (!%p1244_p7), 0.00390625, %v698_v50  ;;  %v729_v45 = vld [vmem:[%s2005_s2 + $0x68] sm:$0xff] (!%p1244_p7) }
 0x1eb   : > { %759 = vperm.xlu1 %1389, %v705_v31   ;;  %774 = vperm.xlu0 %1388, %v708_v40   ;;  %v1884_v31 = vld [vmem:[%s2005_s2 + $0x50] sm:$0xff] }
 0x1ec   : > { %v691_v33 = vld [vmem:[#allocation2 + $0x38] sm:$0xff] }
 0x1ed   : > { %v707_v35 = vmul.f32 0.00390625, %v691_v33 }
 0x1ef   : > { %769 = vperm.xlu1 %1389, %v707_v35   ;;  %784 = vperm.xlu0 %1388, %v710_v42   ;;  %v1891_v35 = vld [vmem:[%s2005_s2 + $0x58] sm:$0xff] }
 0x1f0   : > { %v699_v49 = vld [vmem:[#allocation2 + $0x78] sm:$0xff] }
 0x1f1   : > { %v715_v51 = vmul.f32 0.00390625, %v699_v49 }
 0x1f3   : > { %779 = vperm.xlu1 %1389, %v709_v39   ;;  %794 = vperm.xlu0 %1388, %v712_v48  }
 0x1f7   : > { %789 = vperm.xlu1 %1389, %v711_v44   ;;  %804 = vperm.xlu0 %1388, %v714_v52  }
 0x1fb   : > { %799 = vperm.xlu1 %1389, %v713_v47  }
 0x1ff   : > { %809 = vperm.xlu1 %1389, %v715_v51   ;;  %v730_v51 = vld [vmem:[%s2005_s2 + $0x70] sm:$0xff] }
 0x256   : > { %v735_v55 = vpop.permute.xlu0 %734 }
 0x257   : > { %v812_v58 = vmul.f32 %v735_v55, %v1818_v54 }
 0x259   : > { %v829_v1 = vsel %vm828_vm3, %v812_v58, 0.0  ;;  %v731_v58 = vld [vmem:[%s2005_s2 + $0x78] sm:$0xff] }
 0x25a   : > { %v740_v61 = vpop.permute.xlu0 %739 }
 0x25b   : > { %v813_v63 = vmul.f32 %v740_v61, %v1828_v57 }
 0x25d   : > { %v830_v3 = vsel %vm828_vm3, %v813_v63, 0.0 }
 0x25e   : > { %v831_v4 = vadd.f32 %v830_v3, %v829_v1  ;;  %v755_v7 = vpop.permute.xlu0 %754 }
 0x25f   : > { %v816_v9 = vmul.f32 %v755_v7, %v1841_v0 }
 0x261   : > { %v836_v18 = vsel %vm828_vm3, %v816_v9, 0.0 }
 0x262   : > { %v745_v53 = vpop.permute.xlu1 %744 }
 0x263   : > { %v814_v62 = vmul.f32 %v745_v53, %v1823_v56 }
 0x265   : > { %v832_v8 = vsel %vm828_vm3, %v814_v62, 0.0 }
 0x266   : > { %v750_v60 = vpop.permute.xlu1 %749  ;;  %v833_v10 = vadd.f32 %v832_v8, %v831_v4  ;;  %v765_v17 = vpop.permute.xlu0 %764 }
 0x267   : > { %v815_v2 = vmul.f32 %v750_v60, %v1834_v59  ;;  %v818_v19 = vmul.f32 %v765_v17, %v1856_v11 }
 0x269   : > { %v834_v12 = vsel %vm828_vm3, %v815_v2, 0.0  ;;  %v840_v28 = vsel %vm828_vm3, %v818_v19, 0.0 }
 0x26a   : > { %v760_v6 = vpop.permute.xlu1 %759  ;;  %v835_v14 = vadd.f32 %v834_v12, %v833_v10  ;;  %v775_v27 = vpop.permute.xlu0 %774 }
 0x26b   : > { %v817_v13 = vmul.f32 %v760_v6, %v1849_v5  ;;  %v820_v29 = vmul.f32 %v775_v27, %v1870_v21 }
 0x26c   : > { %v837_v20 = vadd.f32 %v836_v18, %v835_v14 }
 0x26d   : > { %v838_v22 = vsel %vm828_vm3, %v817_v13, 0.0  ;;  %v844_v38 = vsel %vm828_vm3, %v820_v29, 0.0 }
 0x26e   : > { %v770_v16 = vpop.permute.xlu1 %769  ;;  %v839_v24 = vadd.f32 %v838_v22, %v837_v20  ;;  %v785_v37 = vpop.permute.xlu0 %784 }
 0x26f   : > { %v819_v23 = vmul.f32 %v770_v16, %v1863_v15  ;;  %v822_v39 = vmul.f32 %v785_v37, %v1884_v31 }
 0x270   : > { %v841_v30 = vadd.f32 %v840_v28, %v839_v24 }
 0x271   : > { %v842_v32 = vsel %vm828_vm3, %v819_v23, 0.0  ;;  %v848_v48 = vsel %vm828_vm3, %v822_v39, 0.0 }
 0x272   : > { %v780_v26 = vpop.permute.xlu1 %779  ;;  %v843_v34 = vadd.f32 %v842_v32, %v841_v30  ;;  %v795_v47 = vpop.permute.xlu0 %794 }
 0x273   : > { %v821_v33 = vmul.f32 %v780_v26, %v1877_v25  ;;  %v824_v49 = vmul.f32 %v795_v47, %v1898_v41 }
 0x274   : > { %v845_v40 = vadd.f32 %v844_v38, %v843_v34 }
 0x275   : > { %v846_v43 = vsel %vm828_vm3, %v821_v33, 0.0  ;;  %v852_v62 = vsel %vm828_vm3, %v824_v49, 0.0 }
 0x276   : > { %v790_v36 = vpop.permute.xlu1 %789  ;;  %v847_v42 = vadd.f32 %v846_v43, %v845_v40  ;;  %v805_v61 = vpop.permute.xlu0 %804 }
 0x277   : > { %v823_v44 = vmul.f32 %v790_v36, %v1891_v35  ;;  %v826_v63 = vmul.f32 %v805_v61, %v730_v51 }
 0x278   : > { %v849_v50 = vadd.f32 %v848_v48, %v847_v42 }
 0x279   : > { %v850_v52 = vsel %vm828_vm3, %v823_v44, 0.0  ;;  %v856_v6 = vsel %vm828_vm3, %v826_v63, 0.0 }
 0x27a   : > { %v800_v46 = vpop.permute.xlu1 %799  ;;  %v851_v55 = vadd.f32 %v850_v52, %v849_v50 }
 0x27b   : > { %v825_v53 = vmul.f32 %v800_v46, %v729_v45 }
 0x27c   : > { %v853_v1 = vadd.f32 %v852_v62, %v851_v55 }
 0x27d   : > { %v854_v2 = vsel %vm828_vm3, %v825_v53, 0.0 }
 0x27e   : > { %v810_v60 = vpop.permute.xlu1 %809  ;;  %v855_v4 = vadd.f32 %v854_v2, %v853_v1 }
 0x27f   : > { %v827_v3 = vmul.f32 %v810_v60, %v731_v58 }
 0x280   : > { %v857_v7 = vadd.f32 %v856_v6, %v855_v4 }
 0x281   : > { %v858_v8 = vsel %vm828_vm3, %v827_v3, 0.0 }
 0x282   : > { %v859_v9 = vadd.f32 %v858_v8, %v857_v7 }
 0x284   : > { %v860_v10 = vrot.slane %v859_v9, 4 }
 0x286   : > { %v861_v12 = vadd.f32 %v860_v10, %v859_v9 }
 0x288   : > { %v862_v13 = vrot.slane %v861_v12, 2 }
 0x28a   : > { %v863_v14 = vadd.f32 %v862_v13, %v861_v12 }
 0x28c   : > { %v864_v16 = vrot.slane %v863_v14, 1 }
 0x28e   : > { %v865_v17 = vadd.f32 %v864_v16, %v863_v14 }
 0x290   : > { %v866_v18 = vmax.f32 %v865_v17, 0.0 }
 0x292   : > { %868 = vrot.lane.b32.xlu0 %v866_v18, %s1557_s11 }
 0x304   : > { %v869_v19 = vpop.permute.xlu0 %868 }
 0x305   : > { %v872_v20 = vmul.f32 %v869_v19, %v1828_v57  ;;  %v871_v22 = vmul.f32 %v869_v19, %v1818_v54  ;;  %v874_v23 = vmul.f32 %v869_v19, %v1834_v59  ;;  %v873_v24 = vmul.f32 %v869_v19, %v1823_v56 }
 0x306   : > { %v876_v26 = vmul.f32 %v869_v19, %v1849_v5  ;;  %v875_v27 = vmul.f32 %v869_v19, %v1841_v0  ;;  %v878_v28 = vmul.f32 %v869_v19, %v1863_v15  ;;  %v877_v57 = vmul.f32 %v869_v19, %v1856_v11 }
 0x307   : > { %905 = vrot.lane.b32.xlu0 %v872_v20, %s1558_s22  ;;  %903 = vrot.lane.b32.xlu1 %v871_v22, %s1558_s22  ;;  %v880_v54 = vmul.f32 %v869_v19, %v1877_v25  ;;  %v879_v59 = vmul.f32 %v869_v19, %v1870_v21  ;;  %v882_v56 = vmul.f32 %v869_v19, %v1891_v35 }
 0x308   : > { %v881_v5 = vmul.f32 %v869_v19, %v1884_v31  ;;  %v884_v0 = vmul.f32 %v869_v19, %v729_v45  ;;  %v883_v29 = vmul.f32 %v869_v19, %v1898_v41  ;;  %v886_v11 = vmul.f32 %v869_v19, %v731_v58 }
 0x309   : > { %v885_v15 = vmul.f32 %v869_v19, %v730_v51 }
 0x30b   : > { %909 = vrot.lane.b32.xlu0 %v874_v23, %s1558_s22  ;;  %907 = vrot.lane.b32.xlu1 %v873_v24, %s1558_s22 }
 0x30f   : > { %913 = vrot.lane.b32.xlu0 %v876_v26, %s1558_s22  ;;  %911 = vrot.lane.b32.xlu1 %v875_v27, %s1558_s22 }
 0x313   : > { %917 = vrot.lane.b32.xlu0 %v878_v28, %s1558_s22  ;;  %915 = vrot.lane.b32.xlu1 %v877_v57, %s1558_s22 }
 0x317   : > { %921 = vrot.lane.b32.xlu0 %v880_v54, %s1558_s22  ;;  %919 = vrot.lane.b32.xlu1 %v879_v59, %s1558_s22 }
 0x31b   : > { %925 = vrot.lane.b32.xlu0 %v882_v56, %s1558_s22  ;;  %923 = vrot.lane.b32.xlu1 %v881_v5, %s1558_s22 }
 0x31f   : > { %929 = vrot.lane.b32.xlu0 %v884_v0, %s1558_s22  ;;  %927 = vrot.lane.b32.xlu1 %v883_v29, %s1558_s22 }
 0x323   : > { %933 = vrot.lane.b32.xlu0 %v886_v11, %s1558_s22  ;;  %931 = vrot.lane.b32.xlu1 %v885_v15, %s1558_s22 }
 0x379   : > { %v906_v25 = vpop.permute.xlu0 %905  ;;  %v904_v21 = vpop.permute.xlu1 %903 }
 0x37a   : > { %v955_v30 = vsel %vm951_vm4, %v906_v25, 0.0  ;;  %v952_v32 = vsel %vm951_vm4, %v904_v21, 0.0 }
 0x37b   : > { %956 = vadd.xlane.f32.xlu0 %v955_v30  ;;  %953 = vadd.xlane.f32.xlu1 %v952_v32 }
 0x37d   : > { %v910_v31 = vpop.permute.xlu0 %909  ;;  %v908_v33 = vpop.permute.xlu1 %907 }
 0x37e   : > { %v961_v34 = vsel %vm951_vm4, %v910_v31, 0.0  ;;  %v958_v35 = vsel %vm951_vm4, %v908_v33, 0.0 }
 0x37f   : > { %962 = vadd.xlane.f32.xlu1 %v961_v34  ;;  %959 = vadd.xlane.f32.xlu0 %v958_v35 }
 0x381   : > { %v914_v36 = vpop.permute.xlu0 %913  ;;  %v912_v37 = vpop.permute.xlu1 %911 }
 0x382   : > { %v967_v38 = vsel %vm951_vm4, %v914_v36, 0.0  ;;  %v964_v39 = vsel %vm951_vm4, %v912_v37, 0.0 }
 0x383   : > { %968 = vadd.xlane.f32.xlu1 %v967_v38  ;;  %965 = vadd.xlane.f32.xlu0 %v964_v39 }
 0x385   : > { %v918_v40 = vpop.permute.xlu0 %917  ;;  %v916_v41 = vpop.permute.xlu1 %915 }
 0x386   : > { %v973_v43 = vsel %vm951_vm4, %v918_v40, 0.0  ;;  %v970_v44 = vsel %vm951_vm4, %v916_v41, 0.0 }
 0x387   : > { %974 = vadd.xlane.f32.xlu1 %v973_v43  ;;  %971 = vadd.xlane.f32.xlu0 %v970_v44 }
 0x389   : > { %v922_v42 = vpop.permute.xlu0 %921  ;;  %v920_v45 = vpop.permute.xlu1 %919 }
 0x38a   : > { %v979_v46 = vsel %vm951_vm4, %v922_v42, 0.0  ;;  %v976_v47 = vsel %vm951_vm4, %v920_v45, 0.0 }
 0x38b   : > { %980 = vadd.xlane.f32.xlu1 %v979_v46  ;;  %977 = vadd.xlane.f32.xlu0 %v976_v47 }
 0x38d   : > { %v926_v48 = vpop.permute.xlu0 %925  ;;  %v924_v49 = vpop.permute.xlu1 %923 }
 0x38e   : > { %v985_v50 = vsel %vm951_vm4, %v926_v48, 0.0  ;;  %v982_v51 = vsel %vm951_vm4, %v924_v49, 0.0 }
 0x38f   : > { %986 = vadd.xlane.f32.xlu1 %v985_v50  ;;  %983 = vadd.xlane.f32.xlu0 %v982_v51 }
 0x391   : > { %v930_v52 = vpop.permute.xlu0 %929  ;;  %v928_v53 = vpop.permute.xlu1 %927 }
 0x392   : > { %v991_v55 = vsel %vm951_vm4, %v930_v52, 0.0  ;;  %v988_v58 = vsel %vm951_vm4, %v928_v53, 0.0 }
 0x393   : > { %992 = vadd.xlane.f32.xlu1 %v991_v55  ;;  %989 = vadd.xlane.f32.xlu0 %v988_v58 }
 0x395   : > { %v934_v60 = vpop.permute.xlu0 %933  ;;  %v932_v61 = vpop.permute.xlu1 %931 }
 0x396   : > { %v997_v62 = vsel %vm951_vm4, %v934_v60, 0.0  ;;  %v994_v63 = vsel %vm951_vm4, %v932_v61, 0.0 }
 0x397   : > { %998 = vadd.xlane.f32.xlu1 %v997_v62  ;;  %995 = vadd.xlane.f32.xlu0 %v994_v63 }
 0x408   : > { %v957_v1 = vpop.xlane.xlu0 %956  ;;  %v954_v2 = vpop.xlane.xlu1 %953 }
 0x409   : > { %v1001_v3 = vsub.f32 0.0, %v957_v1  ;;  %v1000_v4 = vsub.f32 0.0, %v954_v2 }
 0x40b   : > { %v1018_v6 = vmul.f32 1.442695, %v1001_v3  ;;  %v1016_v7 = vmul.f32 1.442695, %v1000_v4 }
 0x40c   : > { %v960_v8 = vpop.xlane.xlu0 %959  ;;  %v963_v9 = vpop.xlane.xlu1 %962 }
 0x40d   : > { %1390 = vpow2.f32 %v1018_v6  ;;  %v1002_v10 = vsub.f32 0.0, %v960_v8  ;;  %v1003_v12 = vsub.f32 0.0, %v963_v9 }
 0x40e   : > { %1392 = vpow2.f32 %v1016_v7 }
 0x40f   : > { %v1020_v13 = vmul.f32 1.442695, %v1002_v10  ;;  %v1022_v14 = vmul.f32 1.442695, %v1003_v12 }
 0x410   : > { %v966_v16 = vpop.xlane.xlu0 %965  ;;  %v969_v17 = vpop.xlane.xlu1 %968 }
 0x411   : > { %1394 = vpow2.f32 %v1020_v13  ;;  %v1004_v18 = vsub.f32 0.0, %v966_v16  ;;  %v1005_v19 = vsub.f32 0.0, %v969_v17 }
 0x412   : > { %1396 = vpow2.f32 %v1022_v14 }
 0x413   : > { %v1024_v20 = vmul.f32 1.442695, %v1004_v18  ;;  %v1026_v22 = vmul.f32 1.442695, %v1005_v19 }
 0x414   : > { %v972_v23 = vpop.xlane.xlu0 %971  ;;  %v975_v24 = vpop.xlane.xlu1 %974 }
 0x415   : > { %1398 = vpow2.f32 %v1024_v20  ;;  %v1006_v26 = vsub.f32 0.0, %v972_v23  ;;  %v1007_v27 = vsub.f32 0.0, %v975_v24 }
 0x416   : > { %1400 = vpow2.f32 %v1026_v22 }
 0x417   : > { %v1391_v28 = vpop.eup %1390  ;;  %v1028_v57 = vmul.f32 1.442695, %v1006_v26  ;;  %v1030_v56 = vmul.f32 1.442695, %v1007_v27 }
 0x418   : > { %v1393_v54 = vpop.eup %1392  ;;  %v1049_v59 = vadd.f32 1.0, %v1391_v28  ;;  %v978_v5 = vpop.xlane.xlu0 %977 }
 0x419   : > { %v981_v0 = vpop.xlane.xlu1 %980  ;;  %v1048_v29 = vadd.f32 1.0, %v1393_v54  ;;  %1402 = vpow2.f32 %v1028_v57  ;;  %v1008_v11 = vsub.f32 0.0, %v978_v5 }
 0x41a   : > { %v1009_v15 = vsub.f32 0.0, %v981_v0  ;;  %1404 = vrcp.f32 %v1049_v59 }
 0x41b   : > { %v1395_v25 = vpop.eup %1394  ;;  %1406 = vrcp.f32 %v1048_v29  ;;  %v1032_v21 = vmul.f32 1.442695, %v1008_v11 }
 0x41c   : > { %v1397_v30 = vpop.eup %1396  ;;  %v1050_v32 = vadd.f32 1.0, %v1395_v25  ;;  %1408 = vpow2.f32 %v1030_v56  ;;  %v1034_v31 = vmul.f32 1.442695, %v1009_v15  ;;  %v984_v33 = vpop.xlane.xlu0 %983 }
 0x41d   : > { %v987_v34 = vpop.xlane.xlu1 %986  ;;  %v1051_v35 = vadd.f32 1.0, %v1397_v30  ;;  %1410 = vpow2.f32 %v1032_v21  ;;  %v1010_v36 = vsub.f32 0.0, %v984_v33 }
 0x41e   : > { %v1011_v37 = vsub.f32 0.0, %v987_v34  ;;  %1412 = vrcp.f32 %v1050_v32 }
 0x41f   : > { %v1399_v38 = vpop.eup %1398  ;;  %1414 = vrcp.f32 %v1051_v35  ;;  %v1036_v39 = vmul.f32 1.442695, %v1010_v36 }
 0x420   : > { %v1401_v40 = vpop.eup %1400  ;;  %v1052_v41 = vadd.f32 1.0, %v1399_v38  ;;  %1416 = vpow2.f32 %v1034_v31  ;;  %v1038_v43 = vmul.f32 1.442695, %v1011_v37  ;;  %v990_v44 = vpop.xlane.xlu0 %989 }
 0x421   : > { %v993_v42 = vpop.xlane.xlu1 %992  ;;  %v1053_v45 = vadd.f32 1.0, %v1401_v40  ;;  %1418 = vpow2.f32 %v1036_v39  ;;  %v1012_v46 = vsub.f32 0.0, %v990_v44 }
 0x422   : > { %v1013_v47 = vsub.f32 0.0, %v993_v42  ;;  %1420 = vrcp.f32 %v1052_v41 }
 0x423   : > { %v1403_v48 = vpop.eup %1402  ;;  %1422 = vrcp.f32 %v1053_v45  ;;  %v1040_v49 = vmul.f32 1.442695, %v1012_v46 }
 0x424   : > { %v1042_v50 = vmul.f32 1.442695, %v1013_v47  ;;  %v1405_v51 = vpop.eup %1404  ;;  %v1054_v52 = vadd.f32 1.0, %v1403_v48  ;;  %1424 = vpow2.f32 %v1038_v43  ;;  %v996_v53 = vpop.xlane.xlu0 %995 }
 0x425   : > { %v999_v55 = vpop.xlane.xlu1 %998  ;;  %v1407_v58 = vpop.eup %1406  ;;  %1097 = vst.msk [vmem:[%s1704_s7 + $0x8] sm:$0xff] %vm663_vm2, %v1405_v51  ;;  %1426 = vpow2.f32 %v1040_v49  ;;  %v1014_v60 = vsub.f32 0.0, %v996_v53 }
 0x426   : > { %v1015_v61 = vsub.f32 0.0, %v999_v55  ;;  %v1409_v62 = vpop.eup %1408  ;;  %1096 = vst.msk [vmem:[%s1704_s7] sm:$0xff] %vm663_vm2, %v1407_v58  ;;  %1428 = vrcp.f32 %v1054_v52 }
 0x427   : > { %v1411_v63 = vpop.eup %1410  ;;  %v1055_v1 = vadd.f32 1.0, %v1409_v62  ;;  %1430 = vpow2.f32 %v1042_v50  ;;  %v1044_v2 = vmul.f32 1.442695, %v1014_v60 }
 0x428   : > { %v1413_v3 = vpop.eup %1412  ;;  %v1056_v4 = vadd.f32 1.0, %v1411_v63  ;;  %v1046_v6 = vmul.f32 1.442695, %v1015_v61 }
 0x429   : > { %v1415_v7 = vpop.eup %1414  ;;  %1098 = vst.msk [vmem:[%s1704_s7 + $0x10] sm:$0xff] %vm663_vm2, %v1413_v3  ;;  %1432 = vrcp.f32 %v1055_v1 }
 0x42a   : > { %v1417_v8 = vpop.eup %1416  ;;  %1099 = vst.msk [vmem:[%s1704_s7 + $0x18] sm:$0xff] %vm663_vm2, %v1415_v7  ;;  %1434 = vrcp.f32 %v1056_v4 }
 0x42b   : > { %v1419_v9 = vpop.eup %1418  ;;  %v1057_v10 = vadd.f32 1.0, %v1417_v8  ;;  %1436 = vpow2.f32 %v1044_v2 }
 0x42c   : > { %v1421_v12 = vpop.eup %1420  ;;  %v1058_v13 = vadd.f32 1.0, %v1419_v9  ;;  %1438 = vpow2.f32 %v1046_v6 }
 0x42d   : > { %v1423_v14 = vpop.eup %1422  ;;  %1100 = vst.msk [vmem:[%s1704_s7 + $0x20] sm:$0xff] %vm663_vm2, %v1421_v12  ;;  %1440 = vrcp.f32 %v1057_v10 }
 0x42e   : > { %v1425_v16 = vpop.eup %1424  ;;  %1101 = vst.msk [vmem:[%s1704_s7 + $0x28] sm:$0xff] %vm663_vm2, %v1423_v14  ;;  %1442 = vrcp.f32 %v1058_v13 }
 0x42f   : > { %v1427_v17 = vpop.eup %1426  ;;  %v1059_v18 = vadd.f32 1.0, %v1425_v16 }
 0x430   : > { %v1429_v19 = vpop.eup %1428  ;;  %v1060_v20 = vadd.f32 1.0, %v1427_v17 }
 0x431   : > { %v1431_v22 = vpop.eup %1430  ;;  %1102 = vst.msk [vmem:[%s1704_s7 + $0x30] sm:$0xff] %vm663_vm2, %v1429_v19  ;;  %1444 = vrcp.f32 %v1059_v18 }
 0x432   : > { %1446 = vrcp.f32 %v1060_v20  ;;  %v1061_v23 = vadd.f32 1.0, %v1431_v22 }
 0x433   : > { %v1433_v24 = vpop.eup %1432 }
 0x434   : > { %v1435_v26 = vpop.eup %1434  ;;  %1103 = vst.msk [vmem:[%s1704_s7 + $0x38] sm:$0xff] %vm663_vm2, %v1433_v24  ;;  %1448 = vrcp.f32 %v1061_v23 }
 0x435   : > { %v1437_v27 = vpop.eup %1436  ;;  %1104 = vst.msk [vmem:[%s1704_s7 + $0x40] sm:$0xff] %vm663_vm2, %v1435_v26 }
 0x436   : > { %v1439_v28 = vpop.eup %1438  ;;  %v1062_v57 = vadd.f32 1.0, %v1437_v27 }
 0x437   : > { %v1441_v54 = vpop.eup %1440  ;;  %v1063_v59 = vadd.f32 1.0, %v1439_v28 }
 0x438   : > { %v1443_v56 = vpop.eup %1442  ;;  %1105 = vst.msk [vmem:[%s1704_s7 + $0x48] sm:$0xff] %vm663_vm2, %v1441_v54  ;;  %1450 = vrcp.f32 %v1062_v57 }
 0x439   : > { %1106 = vst.msk [vmem:[%s1704_s7 + $0x50] sm:$0xff] %vm663_vm2, %v1443_v56  ;;  %1452 = vrcp.f32 %v1063_v59 }
 0x43b   : > { %v1445_v5 = vpop.eup %1444 }
 0x43c   : > { %v1447_v0 = vpop.eup %1446  ;;  %1107 = vst.msk [vmem:[%s1704_s7 + $0x58] sm:$0xff] %vm663_vm2, %v1445_v5 }
 0x43d   : > { %1108 = vst.msk [vmem:[%s1704_s7 + $0x60] sm:$0xff] %vm663_vm2, %v1447_v0 }
 0x43e   : > { %v1449_v29 = vpop.eup %1448 }
 0x43f   : > { %1109 = vst.msk [vmem:[%s1704_s7 + $0x68] sm:$0xff] %vm663_vm2, %v1449_v29 }
 0x442   : > { %v1451_v11 = vpop.eup %1450 }
 0x443   : > { %v1453_v15 = vpop.eup %1452  ;;  %1110 = vst.msk [vmem:[%s1704_s7 + $0x70] sm:$0xff] %vm663_vm2, %v1451_v11 }
 0x444   : > { %1111 = vst.msk [vmem:[%s1704_s7 + $0x78] sm:$0xff] %vm663_vm2, %v1453_v15 }
 0x445 PF: > { %s16_s19 = sadd.s32 1, %s1548_s19   ;;  %s2009_s12 = smov %s1524_s13 }
 0x446   : > { %p13_p4 = scmp.ge.s32.totalorder %s16_s19, 6   ;;  %s2010_s13 = smov %s1528_s14 }
 0x447   : > { %s2011_s14 = smov %s1643_s29  ;;  %s2012_s15 = smov %s1540_s17 }
 0x448   : > { %s2013_s16 = smov %s1544_s18  ;;  %s2014_s17 = smov %s2017_s20 }
 0x449   : > { %s2015_s18 = smov %s2021_s21  ;;  %15 = sbr.rel (!%p13_p4) target bundleno = 5 (0x5), region = 126 }
 0x450   :  { %1133 = vsyncpa [#allocation5], 1 }
 0x451   :  { %1135 = vsyncpa [#allocation5 + $0x1], 1 }

</bundles_post_ra>
